<compile_context>
chip_gen: v7x
topology: tpu7x:2x2x1
jax: 0.10.0
libtpu: 0.0.40
codegen_flags: <defaults>
</compile_context>

<pallas_src>
import functools

import jax
import jax.numpy as jnp
from jax.experimental import pallas as pl
from jax.experimental.pallas import tpu as pltpu

_EPS = 1e-6


# ---------------------------------------------------------------------------
# Component-wise SE3 / SO3 Lie-group math.  Every pose is a 7-tuple of arrays
# (tx, ty, tz, qx, qy, qz, qw); all ops are pure per-lane VPU arithmetic so the
# same code serves the lane-dense kernel tiles and the plain-JAX reference.
# ---------------------------------------------------------------------------
def _cross_c(a, b):
    ax, ay, az = a
    bx, by, bz = b
    return (ay * bz - az * by, az * bx - ax * bz, ax * by - ay * bx)


def _q_mul_c(q1, q2):
    x1, y1, z1, w1 = q1
    x2, y2, z2, w2 = q2
    x = w1 * x2 + x1 * w2 + y1 * z2 - z1 * y2
    y = w1 * y2 - x1 * z2 + y1 * w2 + z1 * x2
    z = w1 * z2 + x1 * y2 - y1 * x2 + z1 * w2
    w = w1 * w2 - x1 * x2 - y1 * y2 - z1 * z2
    return (x, y, z, w)


def _q_conj_c(q):
    x, y, z, w = q
    return (-x, -y, -z, w)


def _q_rotate_c(q, v):
    x, y, z, w = q
    u = (x, y, z)
    tx, ty, tz = _cross_c(u, v)
    tx, ty, tz = 2.0 * tx, 2.0 * ty, 2.0 * tz
    cx, cy, cz = _cross_c(u, (tx, ty, tz))
    return (v[0] + w * tx + cx, v[1] + w * ty + cy, v[2] + w * tz + cz)


def _se3_inv_c(p):
    tx, ty, tz, qx, qy, qz, qw = p
    qi = _q_conj_c((qx, qy, qz, qw))
    rx, ry, rz = _q_rotate_c(qi, (tx, ty, tz))
    return (-rx, -ry, -rz) + qi


def _se3_compose_c(a, b):
    ta, qa = a[0:3], a[3:7]
    tb, qb = b[0:3], b[3:7]
    rx, ry, rz = _q_rotate_c(qa, tb)
    q = _q_mul_c(qa, qb)
    return (ta[0] + rx, ta[1] + ry, ta[2] + rz) + q


def _so3_log_c(q):
    x, y, z, w = q
    n2 = x * x + y * y + z * z
    n = jnp.sqrt(n2)
    near = n < _EPS
    n_safe = jnp.where(near, 1.0, n)
    w_safe = jnp.where(jnp.abs(w) < _EPS, 1.0, w)
    wsign = jnp.where(w >= 0.0, 1.0, -1.0)
    # 2*atan(n/w)/n written with a single atan2 so w ~ 0 is handled gracefully
    big = wsign * 2.0 * jnp.arctan2(n, jnp.abs(w)) / n_safe
    small = 2.0 / w_safe - 2.0 * n2 / (3.0 * w_safe ** 3)
    factor = jnp.where(near, small, big)
    return (factor * x, factor * y, factor * z)


def _se3_log_c(p):
    t, q = p[0:3], p[3:7]
    px, py, pz = _so3_log_c(q)
    th2 = px * px + py * py + pz * pz
    th = jnp.sqrt(th2)
    near = th < _EPS
    th_safe = jnp.where(near, 1.0, th)
    th2_safe = jnp.where(near, 1.0, th2)
    s = jnp.sin(th_safe)
    c = jnp.cos(th_safe)
    # TODO(synk): coef = 1/th^2 - (1+cos th)/(2*th*sin th) is 0/0-prone near
    #             th ~ pi in float32 (matches the reference formula).
    coef = jnp.where(
        near,
        1.0 / 12.0 + th2 / 720.0,
        1.0 / th2_safe - (1.0 + c) / (2.0 * th_safe * s),
    )
    phi = (px, py, pz)
    pt = _cross_c(phi, t)
    ppt = _cross_c(phi, pt)
    tau = tuple(t[i] - 0.5 * pt[i] + coef * ppt[i] for i in range(3))
    return tau + phi


def _pose_to_c(pose):
    """(..., 7) pose rows -> 7-tuple of (...,) component arrays."""
    return tuple(pose[..., i] for i in range(7))


# ---------------------------------------------------------------------------
# Pallas kernel: one grid step per R*128 edges, component-major 3-D layout.
# Inputs: rel/n1/n2 as (7, R, 128) tiles; output: (6, R, 128) tangent tile.
# Each component plane ref[i] is a dense (R, 128) slab -> full vreg occupancy,
# no XLU relayouts, unmasked vst on every output plane.
# ---------------------------------------------------------------------------
def _pose_graph_edge_kernel(rel_ref, n1_ref, n2_ref, err_ref):
    def comps(ref):
        return tuple(ref[i] for i in range(7))   # 7 x (R, 128) dense planes

    rel = comps(rel_ref)
    n1 = comps(n1_ref)
    n2 = comps(n2_ref)
    # error = relative_pose @ node1.Inv() @ node2
    err = _se3_log_c(_se3_compose_c(_se3_compose_c(rel, _se3_inv_c(n1)), n2))
    for i in range(6):
        err_ref[i] = err[i]                      # per-plane dense stores


@functools.partial(jax.jit, static_argnames=("tile_e",))
def pose_graph_forward(nodes, edges, relative_poses, tile_e=8192):
    """Returns (prior_error_log (6,), error_log (E, 6)) like PoseGraph.forward."""
    E = edges.shape[0]
    dtype = relative_poses.dtype

    # Tile size: multiple of 1024 (R multiple of 8, 128 lanes), clamped so tiny
    # problems are not over-padded; large problems get >=1024-edge tiles to
    # amortize the per-grid-step overhead.
    tile_e = max(1024, (int(tile_e) // 1024) * 1024)
    tile_e = min(tile_e, pl.cdiv(E, 1024) * 1024)
    e_pad = pl.cdiv(E, tile_e) * tile_e
    pad = e_pad - E
    rows = e_pad // 128            # total sublane rows across all tiles
    tile_r = tile_e // 128         # rows per grid step (multiple of 8)

    # Hoist the node gather out of the kernel: dense (E, 7) operands, then a
    # single fused gather+pad+transpose+reshape producing the padded
    # component-major (7, rows, 128) slab consumed by the kernel.
    node1 = jnp.take(nodes, edges[:, 0], axis=0)
    node2 = jnp.take(nodes, edges[:, 1], axis=0)
    ident = jnp.array([0.0, 0.0, 0.0, 0.0, 0.0, 0.0, 1.0], dtype=dtype)

    def prep(p):
        p = p.astype(dtype)
        if pad:
            p = jnp.concatenate([p, jnp.broadcast_to(ident, (pad, 7))], axis=0)
        return p.T.reshape(7, rows, 128)   # component-major, (8,128)-aligned

    rel_cm = prep(relative_poses)
    n1_cm = prep(node1)
    n2_cm = prep(node2)

    err_cm = pl.pallas_call(
        _pose_graph_edge_kernel,
        out_shape=jax.ShapeDtypeStruct((6, rows, 128), dtype),
        grid_spec=pltpu.PrefetchScalarGridSpec(
            num_scalar_prefetch=0,
            grid=(e_pad // tile_e,),
            in_specs=[
                pl.BlockSpec((7, tile_r, 128), lambda i: (0, i, 0)),  # rel poses
                pl.BlockSpec((7, tile_r, 128), lambda i: (0, i, 0)),  # nodes[e[:,0]]
                pl.BlockSpec((7, tile_r, 128), lambda i: (0, i, 0)),  # nodes[e[:,1]]
            ],
            out_specs=pl.BlockSpec((6, tile_r, 128), lambda i: (0, i, 0)),
        ),
        compiler_params=pltpu.CompilerParams(
            dimension_semantics=("parallel",),
        ),
    )(rel_cm, n1_cm, n2_cm)

    # Back to row-major (E, 6) to match the PyTorch return convention.
    err_log = err_cm.reshape(6, e_pad).T[:E]

    # first_pose is the identity SE3, so prior_error = nodes[0]; its 6-float
    # log is computed in plain JAX (keeps the kernel's grid axis parallel).
    prior_log = jnp.stack(_se3_log_c(_pose_to_c(nodes[0])), axis=-1)
    return prior_log, err_log


def _reference(nodes, edges, relative_poses):
    n1 = _pose_to_c(nodes[edges[:, 0]])
    n2 = _pose_to_c(nodes[edges[:, 1]])
    rel = _pose_to_c(relative_poses)
    err = jnp.stack(
        _se3_log_c(_se3_compose_c(_se3_compose_c(rel, _se3_inv_c(n1)), n2)),
        axis=-1,
    )
    prior = jnp.stack(_se3_log_c(_pose_to_c(nodes[0])), axis=-1)
    return prior, err


if __name__ == "__main__":
    key = jax.random.PRNGKey(0)

    def rand_se3(k, n):
        kt, kq = jax.random.split(k)
        t = 0.5 * jax.random.normal(kt, (n, 3), jnp.float32)
        q = jax.random.normal(kq, (n, 4), jnp.float32)
        q = q / jnp.linalg.norm(q, axis=-1, keepdims=True)
        return jnp.concatenate([t, q], axis=-1)

    # --- small case (matches module-scale shapes): 8 nodes, 8 edges ---------
    N, E = 8, 8
    k1, k2, k3 = jax.random.split(key, 3)
    nodes = rand_se3(k1, N)                 # nn.Parameter(nodes) analogue
    relative_poses = rand_se3(k2, E)
    src = jnp.arange(E, dtype=jnp.int32) % N
    dst = (jnp.arange(E, dtype=jnp.int32) + 1) % N
    edges = jnp.stack([src, dst], axis=-1)  # (E, 2) int32

    prior_log, err_log = pose_graph_forward(nodes, edges, relative_poses)
    jax.block_until_ready((prior_log, err_log))

    ref_prior, ref_err = _reference(nodes, edges, relative_poses)
    assert err_log.shape == (E, 6) and prior_log.shape == (6,)
    assert jnp.allclose(err_log, ref_err, atol=1e-5), "edge error mismatch"
    assert jnp.allclose(prior_log, ref_prior, atol=1e-5), "prior error mismatch"

    # --- multi-tile case: exercises grid > 1 and edge-axis padding ----------
    E2 = 2500
    rel2 = rand_se3(k3, E2)
    src2 = jnp.arange(E2, dtype=jnp.int32) % N
    dst2 = (jnp.arange(E2, dtype=jnp.int32) * 3 + 1) % N
    edges2 = jnp.stack([src2, dst2], axis=-1)

    prior2, err2 = pose_graph_forward(nodes, edges2, rel2, tile_e=1024)
    jax.block_until_ready((prior2, err2))

    ref_prior2, ref_err2 = _reference(nodes, edges2, rel2)
    assert err2.shape == (E2, 6)
    assert jnp.allclose(err2, ref_err2, atol=1e-5), "multi-tile edge error mismatch"
    assert jnp.allclose(prior2, ref_prior2, atol=1e-5), "multi-tile prior mismatch"

    print("KERNEL_OK")
</pallas_src>

<mosaic_0001>
module attributes {stable_mosaic.version = 11 : i64} {
  func.func @_pose_graph_edge_kernel(%arg0: i32, %arg1: memref<7x8x128xf32, #tpu.memory_space<vmem>>, %arg2: memref<7x8x128xf32, #tpu.memory_space<vmem>>, %arg3: memref<7x8x128xf32, #tpu.memory_space<vmem>>, %arg4: memref<6x8x128xf32, #tpu.memory_space<vmem>>) attributes {dimension_semantics = [#tpu.dimension_semantics<parallel>], iteration_bounds = array<i64: 1>, scalar_prefetch = 0 : i64, scratch_operands = 0 : i64, tpu.core_type = #tpu.core_type<tc>, window_params = [{transform_indices = @transform_0, window_bounds = array<i64: 7, 8, 128>}, {transform_indices = @transform_1, window_bounds = array<i64: 7, 8, 128>}, {transform_indices = @transform_2, window_bounds = array<i64: 7, 8, 128>}, {transform_indices = @transform_3, window_bounds = array<i64: 6, 8, 128>}]} {
    %c0 = arith.constant 0 : index
    %c0_0 = arith.constant 0 : index
    %c0_1 = arith.constant 0 : index
    %0 = vector.load %arg1[%c0, %c0_0, %c0_1] : memref<7x8x128xf32, #tpu.memory_space<vmem>>, vector<1x8x128xf32>
    %1 = vector.shape_cast %0 : vector<1x8x128xf32> to vector<8x128xf32>
    %c1 = arith.constant 1 : index
    %c0_2 = arith.constant 0 : index
    %c0_3 = arith.constant 0 : index
    %2 = vector.load %arg1[%c1, %c0_2, %c0_3] : memref<7x8x128xf32, #tpu.memory_space<vmem>>, vector<1x8x128xf32>
    %3 = vector.shape_cast %2 : vector<1x8x128xf32> to vector<8x128xf32>
    %c2 = arith.constant 2 : index
    %c0_4 = arith.constant 0 : index
    %c0_5 = arith.constant 0 : index
    %4 = vector.load %arg1[%c2, %c0_4, %c0_5] : memref<7x8x128xf32, #tpu.memory_space<vmem>>, vector<1x8x128xf32>
    %5 = vector.shape_cast %4 : vector<1x8x128xf32> to vector<8x128xf32>
    %c3 = arith.constant 3 : index
    %c0_6 = arith.constant 0 : index
    %c0_7 = arith.constant 0 : index
    %6 = vector.load %arg1[%c3, %c0_6, %c0_7] : memref<7x8x128xf32, #tpu.memory_space<vmem>>, vector<1x8x128xf32>
    %7 = vector.shape_cast %6 : vector<1x8x128xf32> to vector<8x128xf32>
    %c4 = arith.constant 4 : index
    %c0_8 = arith.constant 0 : index
    %c0_9 = arith.constant 0 : index
    %8 = vector.load %arg1[%c4, %c0_8, %c0_9] : memref<7x8x128xf32, #tpu.memory_space<vmem>>, vector<1x8x128xf32>
    %9 = vector.shape_cast %8 : vector<1x8x128xf32> to vector<8x128xf32>
    %c5 = arith.constant 5 : index
    %c0_10 = arith.constant 0 : index
    %c0_11 = arith.constant 0 : index
    %10 = vector.load %arg1[%c5, %c0_10, %c0_11] : memref<7x8x128xf32, #tpu.memory_space<vmem>>, vector<1x8x128xf32>
    %11 = vector.shape_cast %10 : vector<1x8x128xf32> to vector<8x128xf32>
    %c6 = arith.constant 6 : index
    %c0_12 = arith.constant 0 : index
    %c0_13 = arith.constant 0 : index
    %12 = vector.load %arg1[%c6, %c0_12, %c0_13] : memref<7x8x128xf32, #tpu.memory_space<vmem>>, vector<1x8x128xf32>
    %13 = vector.shape_cast %12 : vector<1x8x128xf32> to vector<8x128xf32>
    %c0_14 = arith.constant 0 : index
    %c0_15 = arith.constant 0 : index
    %c0_16 = arith.constant 0 : index
    %14 = vector.load %arg2[%c0_14, %c0_15, %c0_16] : memref<7x8x128xf32, #tpu.memory_space<vmem>>, vector<1x8x128xf32>
    %15 = vector.shape_cast %14 : vector<1x8x128xf32> to vector<8x128xf32>
    %c1_17 = arith.constant 1 : index
    %c0_18 = arith.constant 0 : index
    %c0_19 = arith.constant 0 : index
    %16 = vector.load %arg2[%c1_17, %c0_18, %c0_19] : memref<7x8x128xf32, #tpu.memory_space<vmem>>, vector<1x8x128xf32>
    %17 = vector.shape_cast %16 : vector<1x8x128xf32> to vector<8x128xf32>
    %c2_20 = arith.constant 2 : index
    %c0_21 = arith.constant 0 : index
    %c0_22 = arith.constant 0 : index
    %18 = vector.load %arg2[%c2_20, %c0_21, %c0_22] : memref<7x8x128xf32, #tpu.memory_space<vmem>>, vector<1x8x128xf32>
    %19 = vector.shape_cast %18 : vector<1x8x128xf32> to vector<8x128xf32>
    %c3_23 = arith.constant 3 : index
    %c0_24 = arith.constant 0 : index
    %c0_25 = arith.constant 0 : index
    %20 = vector.load %arg2[%c3_23, %c0_24, %c0_25] : memref<7x8x128xf32, #tpu.memory_space<vmem>>, vector<1x8x128xf32>
    %21 = vector.shape_cast %20 : vector<1x8x128xf32> to vector<8x128xf32>
    %c4_26 = arith.constant 4 : index
    %c0_27 = arith.constant 0 : index
    %c0_28 = arith.constant 0 : index
    %22 = vector.load %arg2[%c4_26, %c0_27, %c0_28] : memref<7x8x128xf32, #tpu.memory_space<vmem>>, vector<1x8x128xf32>
    %23 = vector.shape_cast %22 : vector<1x8x128xf32> to vector<8x128xf32>
    %c5_29 = arith.constant 5 : index
    %c0_30 = arith.constant 0 : index
    %c0_31 = arith.constant 0 : index
    %24 = vector.load %arg2[%c5_29, %c0_30, %c0_31] : memref<7x8x128xf32, #tpu.memory_space<vmem>>, vector<1x8x128xf32>
    %25 = vector.shape_cast %24 : vector<1x8x128xf32> to vector<8x128xf32>
    %c6_32 = arith.constant 6 : index
    %c0_33 = arith.constant 0 : index
    %c0_34 = arith.constant 0 : index
    %26 = vector.load %arg2[%c6_32, %c0_33, %c0_34] : memref<7x8x128xf32, #tpu.memory_space<vmem>>, vector<1x8x128xf32>
    %27 = vector.shape_cast %26 : vector<1x8x128xf32> to vector<8x128xf32>
    %c0_35 = arith.constant 0 : index
    %c0_36 = arith.constant 0 : index
    %c0_37 = arith.constant 0 : index
    %28 = vector.load %arg3[%c0_35, %c0_36, %c0_37] : memref<7x8x128xf32, #tpu.memory_space<vmem>>, vector<1x8x128xf32>
    %29 = vector.shape_cast %28 : vector<1x8x128xf32> to vector<8x128xf32>
    %c1_38 = arith.constant 1 : index
    %c0_39 = arith.constant 0 : index
    %c0_40 = arith.constant 0 : index
    %30 = vector.load %arg3[%c1_38, %c0_39, %c0_40] : memref<7x8x128xf32, #tpu.memory_space<vmem>>, vector<1x8x128xf32>
    %31 = vector.shape_cast %30 : vector<1x8x128xf32> to vector<8x128xf32>
    %c2_41 = arith.constant 2 : index
    %c0_42 = arith.constant 0 : index
    %c0_43 = arith.constant 0 : index
    %32 = vector.load %arg3[%c2_41, %c0_42, %c0_43] : memref<7x8x128xf32, #tpu.memory_space<vmem>>, vector<1x8x128xf32>
    %33 = vector.shape_cast %32 : vector<1x8x128xf32> to vector<8x128xf32>
    %c3_44 = arith.constant 3 : index
    %c0_45 = arith.constant 0 : index
    %c0_46 = arith.constant 0 : index
    %34 = vector.load %arg3[%c3_44, %c0_45, %c0_46] : memref<7x8x128xf32, #tpu.memory_space<vmem>>, vector<1x8x128xf32>
    %35 = vector.shape_cast %34 : vector<1x8x128xf32> to vector<8x128xf32>
    %c4_47 = arith.constant 4 : index
    %c0_48 = arith.constant 0 : index
    %c0_49 = arith.constant 0 : index
    %36 = vector.load %arg3[%c4_47, %c0_48, %c0_49] : memref<7x8x128xf32, #tpu.memory_space<vmem>>, vector<1x8x128xf32>
    %37 = vector.shape_cast %36 : vector<1x8x128xf32> to vector<8x128xf32>
    %c5_50 = arith.constant 5 : index
    %c0_51 = arith.constant 0 : index
    %c0_52 = arith.constant 0 : index
    %38 = vector.load %arg3[%c5_50, %c0_51, %c0_52] : memref<7x8x128xf32, #tpu.memory_space<vmem>>, vector<1x8x128xf32>
    %39 = vector.shape_cast %38 : vector<1x8x128xf32> to vector<8x128xf32>
    %c6_53 = arith.constant 6 : index
    %c0_54 = arith.constant 0 : index
    %c0_55 = arith.constant 0 : index
    %40 = vector.load %arg3[%c6_53, %c0_54, %c0_55] : memref<7x8x128xf32, #tpu.memory_space<vmem>>, vector<1x8x128xf32>
    %41 = vector.shape_cast %40 : vector<1x8x128xf32> to vector<8x128xf32>
    %cst = arith.constant 0.000000e+00 : f32
    %42 = vector.broadcast %cst : f32 to vector<8x128xf32>
    %43 = arith.subf %42, %21 : vector<8x128xf32>
    %cst_56 = arith.constant 0.000000e+00 : f32
    %44 = vector.broadcast %cst_56 : f32 to vector<8x128xf32>
    %45 = arith.subf %44, %23 : vector<8x128xf32>
    %cst_57 = arith.constant 0.000000e+00 : f32
    %46 = vector.broadcast %cst_57 : f32 to vector<8x128xf32>
    %47 = arith.subf %46, %25 : vector<8x128xf32>
    %48 = arith.mulf %45, %19 : vector<8x128xf32>
    %49 = arith.mulf %47, %17 : vector<8x128xf32>
    %50 = arith.subf %48, %49 : vector<8x128xf32>
    %51 = arith.mulf %47, %15 : vector<8x128xf32>
    %52 = arith.mulf %43, %19 : vector<8x128xf32>
    %53 = arith.subf %51, %52 : vector<8x128xf32>
    %54 = arith.mulf %43, %17 : vector<8x128xf32>
    %55 = arith.mulf %45, %15 : vector<8x128xf32>
    %56 = arith.subf %54, %55 : vector<8x128xf32>
    %cst_58 = arith.constant 2.000000e+00 : f32
    %57 = vector.broadcast %cst_58 : f32 to vector<8x128xf32>
    %58 = arith.mulf %57, %50 : vector<8x128xf32>
    %cst_59 = arith.constant 2.000000e+00 : f32
    %59 = vector.broadcast %cst_59 : f32 to vector<8x128xf32>
    %60 = arith.mulf %59, %53 : vector<8x128xf32>
    %cst_60 = arith.constant 2.000000e+00 : f32
    %61 = vector.broadcast %cst_60 : f32 to vector<8x128xf32>
    %62 = arith.mulf %61, %56 : vector<8x128xf32>
    %63 = arith.mulf %45, %62 : vector<8x128xf32>
    %64 = arith.mulf %47, %60 : vector<8x128xf32>
    %65 = arith.subf %63, %64 : vector<8x128xf32>
    %66 = arith.mulf %47, %58 : vector<8x128xf32>
    %67 = arith.mulf %43, %62 : vector<8x128xf32>
    %68 = arith.subf %66, %67 : vector<8x128xf32>
    %69 = arith.mulf %43, %60 : vector<8x128xf32>
    %70 = arith.mulf %45, %58 : vector<8x128xf32>
    %71 = arith.subf %69, %70 : vector<8x128xf32>
    %72 = arith.mulf %27, %58 : vector<8x128xf32>
    %73 = arith.addf %15, %72 : vector<8x128xf32>
    %74 = arith.addf %73, %65 : vector<8x128xf32>
    %75 = arith.mulf %27, %60 : vector<8x128xf32>
    %76 = arith.addf %17, %75 : vector<8x128xf32>
    %77 = arith.addf %76, %68 : vector<8x128xf32>
    %78 = arith.mulf %27, %62 : vector<8x128xf32>
    %79 = arith.addf %19, %78 : vector<8x128xf32>
    %80 = arith.addf %79, %71 : vector<8x128xf32>
    %cst_61 = arith.constant 0.000000e+00 : f32
    %81 = vector.broadcast %cst_61 : f32 to vector<8x128xf32>
    %82 = arith.subf %81, %74 : vector<8x128xf32>
    %cst_62 = arith.constant 0.000000e+00 : f32
    %83 = vector.broadcast %cst_62 : f32 to vector<8x128xf32>
    %84 = arith.subf %83, %77 : vector<8x128xf32>
    %cst_63 = arith.constant 0.000000e+00 : f32
    %85 = vector.broadcast %cst_63 : f32 to vector<8x128xf32>
    %86 = arith.subf %85, %80 : vector<8x128xf32>
    %87 = arith.mulf %9, %86 : vector<8x128xf32>
    %88 = arith.mulf %11, %84 : vector<8x128xf32>
    %89 = arith.subf %87, %88 : vector<8x128xf32>
    %90 = arith.mulf %11, %82 : vector<8x128xf32>
    %91 = arith.mulf %7, %86 : vector<8x128xf32>
    %92 = arith.subf %90, %91 : vector<8x128xf32>
    %93 = arith.mulf %7, %84 : vector<8x128xf32>
    %94 = arith.mulf %9, %82 : vector<8x128xf32>
    %95 = arith.subf %93, %94 : vector<8x128xf32>
    %cst_64 = arith.constant 2.000000e+00 : f32
    %96 = vector.broadcast %cst_64 : f32 to vector<8x128xf32>
    %97 = arith.mulf %96, %89 : vector<8x128xf32>
    %cst_65 = arith.constant 2.000000e+00 : f32
    %98 = vector.broadcast %cst_65 : f32 to vector<8x128xf32>
    %99 = arith.mulf %98, %92 : vector<8x128xf32>
    %cst_66 = arith.constant 2.000000e+00 : f32
    %100 = vector.broadcast %cst_66 : f32 to vector<8x128xf32>
    %101 = arith.mulf %100, %95 : vector<8x128xf32>
    %102 = arith.mulf %9, %101 : vector<8x128xf32>
    %103 = arith.mulf %11, %99 : vector<8x128xf32>
    %104 = arith.subf %102, %103 : vector<8x128xf32>
    %105 = arith.mulf %11, %97 : vector<8x128xf32>
    %106 = arith.mulf %7, %101 : vector<8x128xf32>
    %107 = arith.subf %105, %106 : vector<8x128xf32>
    %108 = arith.mulf %7, %99 : vector<8x128xf32>
    %109 = arith.mulf %9, %97 : vector<8x128xf32>
    %110 = arith.subf %108, %109 : vector<8x128xf32>
    %111 = arith.mulf %13, %97 : vector<8x128xf32>
    %112 = arith.addf %82, %111 : vector<8x128xf32>
    %113 = arith.addf %112, %104 : vector<8x128xf32>
    %114 = arith.mulf %13, %99 : vector<8x128xf32>
    %115 = arith.addf %84, %114 : vector<8x128xf32>
    %116 = arith.addf %115, %107 : vector<8x128xf32>
    %117 = arith.mulf %13, %101 : vector<8x128xf32>
    %118 = arith.addf %86, %117 : vector<8x128xf32>
    %119 = arith.addf %118, %110 : vector<8x128xf32>
    %120 = arith.mulf %13, %43 : vector<8x128xf32>
    %121 = arith.mulf %7, %27 : vector<8x128xf32>
    %122 = arith.addf %120, %121 : vector<8x128xf32>
    %123 = arith.mulf %9, %47 : vector<8x128xf32>
    %124 = arith.addf %122, %123 : vector<8x128xf32>
    %125 = arith.mulf %11, %45 : vector<8x128xf32>
    %126 = arith.subf %124, %125 : vector<8x128xf32>
    %127 = arith.mulf %13, %45 : vector<8x128xf32>
    %128 = arith.mulf %7, %47 : vector<8x128xf32>
    %129 = arith.subf %127, %128 : vector<8x128xf32>
    %130 = arith.mulf %9, %27 : vector<8x128xf32>
    %131 = arith.addf %129, %130 : vector<8x128xf32>
    %132 = arith.mulf %11, %43 : vector<8x128xf32>
    %133 = arith.addf %131, %132 : vector<8x128xf32>
    %134 = arith.mulf %13, %47 : vector<8x128xf32>
    %135 = arith.mulf %7, %45 : vector<8x128xf32>
    %136 = arith.addf %134, %135 : vector<8x128xf32>
    %137 = arith.mulf %9, %43 : vector<8x128xf32>
    %138 = arith.subf %136, %137 : vector<8x128xf32>
    %139 = arith.mulf %11, %27 : vector<8x128xf32>
    %140 = arith.addf %138, %139 : vector<8x128xf32>
    %141 = arith.mulf %13, %27 : vector<8x128xf32>
    %142 = arith.mulf %7, %43 : vector<8x128xf32>
    %143 = arith.subf %141, %142 : vector<8x128xf32>
    %144 = arith.mulf %9, %45 : vector<8x128xf32>
    %145 = arith.subf %143, %144 : vector<8x128xf32>
    %146 = arith.mulf %11, %47 : vector<8x128xf32>
    %147 = arith.subf %145, %146 : vector<8x128xf32>
    %148 = arith.addf %1, %113 : vector<8x128xf32>
    %149 = arith.addf %3, %116 : vector<8x128xf32>
    %150 = arith.addf %5, %119 : vector<8x128xf32>
    %151 = arith.mulf %133, %33 : vector<8x128xf32>
    %152 = arith.mulf %140, %31 : vector<8x128xf32>
    %153 = arith.subf %151, %152 : vector<8x128xf32>
    %154 = arith.mulf %140, %29 : vector<8x128xf32>
    %155 = arith.mulf %126, %33 : vector<8x128xf32>
    %156 = arith.subf %154, %155 : vector<8x128xf32>
    %157 = arith.mulf %126, %31 : vector<8x128xf32>
    %158 = arith.mulf %133, %29 : vector<8x128xf32>
    %159 = arith.subf %157, %158 : vector<8x128xf32>
    %cst_67 = arith.constant 2.000000e+00 : f32
    %160 = vector.broadcast %cst_67 : f32 to vector<8x128xf32>
    %161 = arith.mulf %160, %153 : vector<8x128xf32>
    %cst_68 = arith.constant 2.000000e+00 : f32
    %162 = vector.broadcast %cst_68 : f32 to vector<8x128xf32>
    %163 = arith.mulf %162, %156 : vector<8x128xf32>
    %cst_69 = arith.constant 2.000000e+00 : f32
    %164 = vector.broadcast %cst_69 : f32 to vector<8x128xf32>
    %165 = arith.mulf %164, %159 : vector<8x128xf32>
    %166 = arith.mulf %133, %165 : vector<8x128xf32>
    %167 = arith.mulf %140, %163 : vector<8x128xf32>
    %168 = arith.subf %166, %167 : vector<8x128xf32>
    %169 = arith.mulf %140, %161 : vector<8x128xf32>
    %170 = arith.mulf %126, %165 : vector<8x128xf32>
    %171 = arith.subf %169, %170 : vector<8x128xf32>
    %172 = arith.mulf %126, %163 : vector<8x128xf32>
    %173 = arith.mulf %133, %161 : vector<8x128xf32>
    %174 = arith.subf %172, %173 : vector<8x128xf32>
    %175 = arith.mulf %147, %161 : vector<8x128xf32>
    %176 = arith.addf %29, %175 : vector<8x128xf32>
    %177 = arith.addf %176, %168 : vector<8x128xf32>
    %178 = arith.mulf %147, %163 : vector<8x128xf32>
    %179 = arith.addf %31, %178 : vector<8x128xf32>
    %180 = arith.addf %179, %171 : vector<8x128xf32>
    %181 = arith.mulf %147, %165 : vector<8x128xf32>
    %182 = arith.addf %33, %181 : vector<8x128xf32>
    %183 = arith.addf %182, %174 : vector<8x128xf32>
    %184 = arith.mulf %147, %35 : vector<8x128xf32>
    %185 = arith.mulf %126, %41 : vector<8x128xf32>
    %186 = arith.addf %184, %185 : vector<8x128xf32>
    %187 = arith.mulf %133, %39 : vector<8x128xf32>
    %188 = arith.addf %186, %187 : vector<8x128xf32>
    %189 = arith.mulf %140, %37 : vector<8x128xf32>
    %190 = arith.subf %188, %189 : vector<8x128xf32>
    %191 = arith.mulf %147, %37 : vector<8x128xf32>
    %192 = arith.mulf %126, %39 : vector<8x128xf32>
    %193 = arith.subf %191, %192 : vector<8x128xf32>
    %194 = arith.mulf %133, %41 : vector<8x128xf32>
    %195 = arith.addf %193, %194 : vector<8x128xf32>
    %196 = arith.mulf %140, %35 : vector<8x128xf32>
    %197 = arith.addf %195, %196 : vector<8x128xf32>
    %198 = arith.mulf %147, %39 : vector<8x128xf32>
    %199 = arith.mulf %126, %37 : vector<8x128xf32>
    %200 = arith.addf %198, %199 : vector<8x128xf32>
    %201 = arith.mulf %133, %35 : vector<8x128xf32>
    %202 = arith.subf %200, %201 : vector<8x128xf32>
    %203 = arith.mulf %140, %41 : vector<8x128xf32>
    %204 = arith.addf %202, %203 : vector<8x128xf32>
    %205 = arith.mulf %147, %41 : vector<8x128xf32>
    %206 = arith.mulf %126, %35 : vector<8x128xf32>
    %207 = arith.subf %205, %206 : vector<8x128xf32>
    %208 = arith.mulf %133, %37 : vector<8x128xf32>
    %209 = arith.subf %207, %208 : vector<8x128xf32>
    %210 = arith.mulf %140, %39 : vector<8x128xf32>
    %211 = arith.subf %209, %210 : vector<8x128xf32>
    %212 = arith.addf %148, %177 : vector<8x128xf32>
    %213 = arith.addf %149, %180 : vector<8x128xf32>
    %214 = arith.addf %150, %183 : vector<8x128xf32>
    %215 = arith.mulf %190, %190 : vector<8x128xf32>
    %216 = arith.mulf %197, %197 : vector<8x128xf32>
    %217 = arith.addf %215, %216 : vector<8x128xf32>
    %218 = arith.mulf %204, %204 : vector<8x128xf32>
    %219 = arith.addf %217, %218 : vector<8x128xf32>
    %220 = math.sqrt %219 : vector<8x128xf32>
    %cst_70 = arith.constant 9.99999997E-7 : f32
    %221 = vector.broadcast %cst_70 : f32 to vector<8x128xf32>
    %222 = arith.cmpf olt, %220, %221 : vector<8x128xf32>
    %cst_71 = arith.constant 1.000000e+00 : f32
    %223 = vector.broadcast %cst_71 : f32 to vector<8x128xf32>
    %224 = arith.select %222, %223, %220 : vector<8x128xi1>, vector<8x128xf32>
    %225 = math.absf %211 : vector<8x128xf32>
    %cst_72 = arith.constant 9.99999997E-7 : f32
    %226 = vector.broadcast %cst_72 : f32 to vector<8x128xf32>
    %227 = arith.cmpf olt, %225, %226 : vector<8x128xf32>
    %cst_73 = arith.constant 1.000000e+00 : f32
    %228 = vector.broadcast %cst_73 : f32 to vector<8x128xf32>
    %229 = arith.select %227, %228, %211 : vector<8x128xi1>, vector<8x128xf32>
    %cst_74 = arith.constant 0.000000e+00 : f32
    %230 = vector.broadcast %cst_74 : f32 to vector<8x128xf32>
    %231 = arith.cmpf oge, %211, %230 : vector<8x128xf32>
    %cst_75 = arith.constant 1.000000e+00 : f32
    %cst_76 = arith.constant -1.000000e+00 : f32
    %232 = vector.broadcast %cst_75 : f32 to vector<8x128xf32>
    %233 = vector.broadcast %cst_76 : f32 to vector<8x128xf32>
    %234 = arith.select %231, %232, %233 : vector<8x128xi1>, vector<8x128xf32>
    %cst_77 = arith.constant 2.000000e+00 : f32
    %235 = vector.broadcast %cst_77 : f32 to vector<8x128xf32>
    %236 = arith.mulf %234, %235 : vector<8x128xf32>
    %237 = math.absf %211 : vector<8x128xf32>
    %238 = math.atan2 %220, %237 : vector<8x128xf32>
    %239 = arith.mulf %236, %238 : vector<8x128xf32>
    %240 = arith.divf %239, %224 : vector<8x128xf32>
    %cst_78 = arith.constant 2.000000e+00 : f32
    %241 = vector.broadcast %cst_78 : f32 to vector<8x128xf32>
    %242 = arith.divf %241, %229 : vector<8x128xf32>
    %cst_79 = arith.constant 2.000000e+00 : f32
    %243 = vector.broadcast %cst_79 : f32 to vector<8x128xf32>
    %244 = arith.mulf %243, %219 : vector<8x128xf32>
    %245 = arith.mulf %229, %229 : vector<8x128xf32>
    %246 = arith.mulf %229, %245 : vector<8x128xf32>
    %cst_80 = arith.constant 3.000000e+00 : f32
    %247 = vector.broadcast %cst_80 : f32 to vector<8x128xf32>
    %248 = arith.mulf %247, %246 : vector<8x128xf32>
    %249 = arith.divf %244, %248 : vector<8x128xf32>
    %250 = arith.subf %242, %249 : vector<8x128xf32>
    %251 = arith.select %222, %250, %240 : vector<8x128xi1>, vector<8x128xf32>
    %252 = arith.mulf %251, %190 : vector<8x128xf32>
    %253 = arith.mulf %251, %197 : vector<8x128xf32>
    %254 = arith.mulf %251, %204 : vector<8x128xf32>
    %255 = arith.mulf %252, %252 : vector<8x128xf32>
    %256 = arith.mulf %253, %253 : vector<8x128xf32>
    %257 = arith.addf %255, %256 : vector<8x128xf32>
    %258 = arith.mulf %254, %254 : vector<8x128xf32>
    %259 = arith.addf %257, %258 : vector<8x128xf32>
    %260 = math.sqrt %259 : vector<8x128xf32>
    %cst_81 = arith.constant 9.99999997E-7 : f32
    %261 = vector.broadcast %cst_81 : f32 to vector<8x128xf32>
    %262 = arith.cmpf olt, %260, %261 : vector<8x128xf32>
    %cst_82 = arith.constant 1.000000e+00 : f32
    %263 = vector.broadcast %cst_82 : f32 to vector<8x128xf32>
    %264 = arith.select %262, %263, %260 : vector<8x128xi1>, vector<8x128xf32>
    %cst_83 = arith.constant 1.000000e+00 : f32
    %265 = vector.broadcast %cst_83 : f32 to vector<8x128xf32>
    %266 = arith.select %262, %265, %259 : vector<8x128xi1>, vector<8x128xf32>
    %267 = math.sin %264 : vector<8x128xf32>
    %268 = math.cos %264 : vector<8x128xf32>
    %cst_84 = arith.constant 7.200000e+02 : f32
    %269 = vector.broadcast %cst_84 : f32 to vector<8x128xf32>
    %270 = arith.divf %259, %269 : vector<8x128xf32>
    %cst_85 = arith.constant 0.0833333358 : f32
    %271 = vector.broadcast %cst_85 : f32 to vector<8x128xf32>
    %272 = arith.addf %271, %270 : vector<8x128xf32>
    %cst_86 = arith.constant 1.000000e+00 : f32
    %273 = vector.broadcast %cst_86 : f32 to vector<8x128xf32>
    %274 = arith.divf %273, %266 : vector<8x128xf32>
    %cst_87 = arith.constant 1.000000e+00 : f32
    %275 = vector.broadcast %cst_87 : f32 to vector<8x128xf32>
    %276 = arith.addf %275, %268 : vector<8x128xf32>
    %cst_88 = arith.constant 2.000000e+00 : f32
    %277 = vector.broadcast %cst_88 : f32 to vector<8x128xf32>
    %278 = arith.mulf %277, %264 : vector<8x128xf32>
    %279 = arith.mulf %278, %267 : vector<8x128xf32>
    %280 = arith.divf %276, %279 : vector<8x128xf32>
    %281 = arith.subf %274, %280 : vector<8x128xf32>
    %282 = arith.select %262, %272, %281 : vector<8x128xi1>, vector<8x128xf32>
    %283 = arith.mulf %253, %214 : vector<8x128xf32>
    %284 = arith.mulf %254, %213 : vector<8x128xf32>
    %285 = arith.subf %283, %284 : vector<8x128xf32>
    %286 = arith.mulf %254, %212 : vector<8x128xf32>
    %287 = arith.mulf %252, %214 : vector<8x128xf32>
    %288 = arith.subf %286, %287 : vector<8x128xf32>
    %289 = arith.mulf %252, %213 : vector<8x128xf32>
    %290 = arith.mulf %253, %212 : vector<8x128xf32>
    %291 = arith.subf %289, %290 : vector<8x128xf32>
    %292 = arith.mulf %253, %291 : vector<8x128xf32>
    %293 = arith.mulf %254, %288 : vector<8x128xf32>
    %294 = arith.subf %292, %293 : vector<8x128xf32>
    %295 = arith.mulf %254, %285 : vector<8x128xf32>
    %296 = arith.mulf %252, %291 : vector<8x128xf32>
    %297 = arith.subf %295, %296 : vector<8x128xf32>
    %298 = arith.mulf %252, %288 : vector<8x128xf32>
    %299 = arith.mulf %253, %285 : vector<8x128xf32>
    %300 = arith.subf %298, %299 : vector<8x128xf32>
    %cst_89 = arith.constant 5.000000e-01 : f32
    %301 = vector.broadcast %cst_89 : f32 to vector<8x128xf32>
    %302 = arith.mulf %301, %285 : vector<8x128xf32>
    %303 = arith.subf %212, %302 : vector<8x128xf32>
    %304 = arith.mulf %282, %294 : vector<8x128xf32>
    %305 = arith.addf %303, %304 : vector<8x128xf32>
    %cst_90 = arith.constant 5.000000e-01 : f32
    %306 = vector.broadcast %cst_90 : f32 to vector<8x128xf32>
    %307 = arith.mulf %306, %288 : vector<8x128xf32>
    %308 = arith.subf %213, %307 : vector<8x128xf32>
    %309 = arith.mulf %282, %297 : vector<8x128xf32>
    %310 = arith.addf %308, %309 : vector<8x128xf32>
    %cst_91 = arith.constant 5.000000e-01 : f32
    %311 = vector.broadcast %cst_91 : f32 to vector<8x128xf32>
    %312 = arith.mulf %311, %291 : vector<8x128xf32>
    %313 = arith.subf %214, %312 : vector<8x128xf32>
    %314 = arith.mulf %282, %300 : vector<8x128xf32>
    %315 = arith.addf %313, %314 : vector<8x128xf32>
    %c0_92 = arith.constant 0 : index
    %c0_93 = arith.constant 0 : index
    %c0_94 = arith.constant 0 : index
    %316 = vector.load %arg4[%c0_92, %c0_93, %c0_94] : memref<6x8x128xf32, #tpu.memory_space<vmem>>, vector<1x8x128xf32>
    %317 = vector.shape_cast %316 : vector<1x8x128xf32> to vector<8x128xf32>
    %318 = vector.shape_cast %305 : vector<8x128xf32> to vector<1x8x128xf32>
    tpu.vector_store %arg4[%c0_92, %c0_93, %c0_94], %318 {strides = array<i32>} : memref<6x8x128xf32, #tpu.memory_space<vmem>>, vector<1x8x128xf32>,
    %c1_95 = arith.constant 1 : index
    %c0_96 = arith.constant 0 : index
    %c0_97 = arith.constant 0 : index
    %319 = vector.load %arg4[%c1_95, %c0_96, %c0_97] : memref<6x8x128xf32, #tpu.memory_space<vmem>>, vector<1x8x128xf32>
    %320 = vector.shape_cast %319 : vector<1x8x128xf32> to vector<8x128xf32>
    %321 = vector.shape_cast %310 : vector<8x128xf32> to vector<1x8x128xf32>
    tpu.vector_store %arg4[%c1_95, %c0_96, %c0_97], %321 {strides = array<i32>} : memref<6x8x128xf32, #tpu.memory_space<vmem>>, vector<1x8x128xf32>,
    %c2_98 = arith.constant 2 : index
    %c0_99 = arith.constant 0 : index
    %c0_100 = arith.constant 0 : index
    %322 = vector.load %arg4[%c2_98, %c0_99, %c0_100] : memref<6x8x128xf32, #tpu.memory_space<vmem>>, vector<1x8x128xf32>
    %323 = vector.shape_cast %322 : vector<1x8x128xf32> to vector<8x128xf32>
    %324 = vector.shape_cast %315 : vector<8x128xf32> to vector<1x8x128xf32>
    tpu.vector_store %arg4[%c2_98, %c0_99, %c0_100], %324 {strides = array<i32>} : memref<6x8x128xf32, #tpu.memory_space<vmem>>, vector<1x8x128xf32>,
    %c3_101 = arith.constant 3 : index
    %c0_102 = arith.constant 0 : index
    %c0_103 = arith.constant 0 : index
    %325 = vector.load %arg4[%c3_101, %c0_102, %c0_103] : memref<6x8x128xf32, #tpu.memory_space<vmem>>, vector<1x8x128xf32>
    %326 = vector.shape_cast %325 : vector<1x8x128xf32> to vector<8x128xf32>
    %327 = vector.shape_cast %252 : vector<8x128xf32> to vector<1x8x128xf32>
    tpu.vector_store %arg4[%c3_101, %c0_102, %c0_103], %327 {strides = array<i32>} : memref<6x8x128xf32, #tpu.memory_space<vmem>>, vector<1x8x128xf32>,
    %c4_104 = arith.constant 4 : index
    %c0_105 = arith.constant 0 : index
    %c0_106 = arith.constant 0 : index
    %328 = vector.load %arg4[%c4_104, %c0_105, %c0_106] : memref<6x8x128xf32, #tpu.memory_space<vmem>>, vector<1x8x128xf32>
    %329 = vector.shape_cast %328 : vector<1x8x128xf32> to vector<8x128xf32>
    %330 = vector.shape_cast %253 : vector<8x128xf32> to vector<1x8x128xf32>
    tpu.vector_store %arg4[%c4_104, %c0_105, %c0_106], %330 {strides = array<i32>} : memref<6x8x128xf32, #tpu.memory_space<vmem>>, vector<1x8x128xf32>,
    %c5_107 = arith.constant 5 : index
    %c0_108 = arith.constant 0 : index
    %c0_109 = arith.constant 0 : index
    %331 = vector.load %arg4[%c5_107, %c0_108, %c0_109] : memref<6x8x128xf32, #tpu.memory_space<vmem>>, vector<1x8x128xf32>
    %332 = vector.shape_cast %331 : vector<1x8x128xf32> to vector<8x128xf32>
    %333 = vector.shape_cast %254 : vector<8x128xf32> to vector<1x8x128xf32>
    tpu.vector_store %arg4[%c5_107, %c0_108, %c0_109], %333 {strides = array<i32>} : memref<6x8x128xf32, #tpu.memory_space<vmem>>, vector<1x8x128xf32>,
    return
  }
  func.func @transform_0(%arg0: i32) -> (i32, i32, i32) {
    %c0_i32 = arith.constant 0 : i32
    %c0_i32_0 = arith.constant 0 : i32
    %c0_i32_1 = arith.constant 0 : i32
    return %c0_i32, %arg0, %c0_i32_0 : i32, i32, i32
  }
  func.func @transform_1(%arg0: i32) -> (i32, i32, i32) {
    %c0_i32 = arith.constant 0 : i32
    %c0_i32_0 = arith.constant 0 : i32
    %c0_i32_1 = arith.constant 0 : i32
    return %c0_i32, %arg0, %c0_i32_0 : i32, i32, i32
  }
  func.func @transform_2(%arg0: i32) -> (i32, i32, i32) {
    %c0_i32 = arith.constant 0 : i32
    %c0_i32_0 = arith.constant 0 : i32
    %c0_i32_1 = arith.constant 0 : i32
    return %c0_i32, %arg0, %c0_i32_0 : i32, i32, i32
  }
  func.func @transform_3(%arg0: i32) -> (i32, i32, i32) {
    %c0_i32 = arith.constant 0 : i32
    %c0_i32_0 = arith.constant 0 : i32
    %c0_i32_1 = arith.constant 0 : i32
    return %c0_i32, %arg0, %c0_i32_0 : i32, i32, i32
  }
}

</mosaic_0001>

<bundles_post_ra>
// kernel: pose_graph_forward.1
= control target key start
LH: loop header
LB: loop body
LE: loop exit
PB: predicated region body
PF: predicated region fallthrough
CT: control target
= control target key end

     0   :  { %s1007_s0 = inlined_call_operand.vmem [shape: f32[7,8,128], index: 0, kind: input, shape index: {}]   ;;  %s1008_s1 = inlined_call_operand.vmem [shape: f32[7,8,128], index: 1, kind: input, shape index: {}]   ;;  %s1009_s2 = inlined_call_operand.vmem [shape: f32[7,8,128], index: 2, kind: input, shape index: {}]   ;;  %s1010_s3 = inlined_call_operand.vmem [shape: f32[6,8,128], index: 3, kind: output, shape index: {}]  }
   0x1   :  { %v665_v0 = vld [vmem:[%s1007_s0 + $0x18] sm:$0xff]  ;;  %v670_v1 = vld [vmem:[%s1007_s0 + $0x20] sm:$0xff]  ;;  %v675_v2 = vld [vmem:[%s1007_s0 + $0x28] sm:$0xff] }
   0x2   :  { %v27_v3 = vld [vmem:[%s1008_s1] sm:$0xff]  ;;  %v577_v4 = vld [vmem:[%s1008_s1 + $0x8] sm:$0xff]  ;;  %v578_v5 = vld [vmem:[%s1008_s1 + $0x10] sm:$0xff] }
   0x3   :  { %v579_v6 = vld [vmem:[%s1008_s1 + $0x18] sm:$0xff]  ;;  %v580_v7 = vld [vmem:[%s1008_s1 + $0x20] sm:$0xff]  ;;  %v695_v8 = vld [vmem:[%s1007_s0 + $0x30] sm:$0xff] }
   0x4   :  { %v581_v9 = vld [vmem:[%s1008_s1 + $0x28] sm:$0xff]  ;;  %v582_v10 = vld [vmem:[%s1008_s1 + $0x30] sm:$0xff]  ;;  %v53_v11 = vsub.f32 0.0, %v579_v6  ;;  %v54_v12 = vsub.f32 0.0, %v580_v7  ;;  %v735_v63 = vld [vmem:[%s1009_s2] sm:$0xff] }
   0x5   :  { %v55_v13 = vsub.f32 0.0, %v581_v9  ;;  %v120_v14 = vmul.f32 %v582_v10, %v665_v0  ;;  %v129_v15 = vmul.f32 %v582_v10, %v670_v1  ;;  %v706_v16 = vmul.f32 %v582_v10, %v675_v2  ;;  %v722_v53 = vld [vmem:[%s1009_s2 + $0x10] sm:$0xff]  ;;  %v729_v58 = vld [vmem:[%s1009_s2 + $0x8] sm:$0xff] }
   0x6   :  { %v56_v17 = vmul.f32 %v578_v5, %v54_v12  ;;  %v60_v18 = vmul.f32 %v578_v5, %v53_v11  ;;  %v62_v19 = vmul.f32 %v577_v4, %v53_v11  ;;  %v63_v20 = vmul.f32 %v54_v12, %v27_v3 }
   0x7   :  { %v57_v21 = vmul.f32 %v577_v4, %v55_v13  ;;  %v59_v22 = vmul.f32 %v55_v13, %v27_v3  ;;  %v119_v23 = vmul.f32 %v695_v8, %v53_v11  ;;  %v122_v24 = vmul.f32 %v670_v1, %v55_v13 }
   0x8   :  { %v64_v25 = vsub.f32 %v62_v19, %v63_v20  ;;  %v124_v26 = vmul.f32 %v675_v2, %v54_v12  ;;  %v126_v27 = vmul.f32 %v695_v8, %v54_v12  ;;  %v127_v28 = vmul.f32 %v665_v0, %v55_v13 }
   0x9   :  { %v58_v29 = vsub.f32 %v56_v17, %v57_v21  ;;  %v61_v30 = vsub.f32 %v59_v22, %v60_v18  ;;  %v121_v31 = vadd.f32 %v120_v14, %v119_v23  ;;  %v131_v32 = vmul.f32 %v675_v2, %v53_v11 }
   0xa   :  { %v67_v33 = vmul.f32 2.0, %v64_v25  ;;  %v128_v34 = vsub.f32 %v126_v27, %v127_v28  ;;  %v133_v35 = vmul.f32 %v695_v8, %v55_v13  ;;  %v134_v36 = vmul.f32 %v665_v0, %v54_v12 }
   0xb   :  { %v65_v37 = vmul.f32 2.0, %v58_v29  ;;  %v66_v38 = vmul.f32 2.0, %v61_v30  ;;  %v123_v39 = vadd.f32 %v122_v24, %v121_v31  ;;  %v136_v40 = vmul.f32 %v670_v1, %v53_v11  ;;  %v772_v30 = vld [vmem:[%s1009_s2 + $0x28] sm:$0xff] }
   0xc   :  { %v68_v41 = vmul.f32 %v67_v33, %v54_v12  ;;  %v72_v42 = vmul.f32 %v67_v33, %v53_v11  ;;  %v83_v43 = vmul.f32 %v582_v10, %v67_v33  ;;  %v130_v44 = vadd.f32 %v129_v15, %v128_v34 }
   0xd   :  { %v69_v45 = vmul.f32 %v66_v38, %v55_v13  ;;  %v71_v46 = vmul.f32 %v65_v37, %v55_v13  ;;  %v74_v47 = vmul.f32 %v66_v38, %v53_v11  ;;  %v75_v48 = vmul.f32 %v65_v37, %v54_v12 }
   0xe   :  { %v77_v49 = vmul.f32 %v582_v10, %v65_v37  ;;  %v80_v50 = vmul.f32 %v582_v10, %v66_v38  ;;  %v84_v51 = vadd.f32 %v578_v5, %v83_v43  ;;  %v717_v52 = vsub.f32 %v123_v39, %v124_v26  ;;  %v763_v26 = vld [vmem:[%s1009_s2 + $0x18] sm:$0xff]  ;;  %v785_v39 = vld [vmem:[%s1009_s2 + $0x20] sm:$0xff] }
   0xf   :  { %v70_v54 = vsub.f32 %v68_v41, %v69_v45  ;;  %v73_v55 = vsub.f32 %v71_v46, %v72_v42  ;;  %v76_v56 = vsub.f32 %v74_v47, %v75_v48  ;;  %v724_v57 = vadd.f32 %v131_v32, %v130_v44 }
  0x10   :  { %v78_v59 = vadd.f32 %v77_v49, %v27_v3  ;;  %v81_v60 = vadd.f32 %v577_v4, %v80_v50  ;;  %v135_v61 = vadd.f32 %v134_v36, %v133_v35  ;;  %v140_v62 = vmul.f32 %v582_v10, %v695_v8  ;;  %v743_v3 = vld [vmem:[%s1009_s2 + $0x30] sm:$0xff] }
  0x11   :  { %v85_v5 = vadd.f32 %v84_v51, %v76_v56  ;;  %v141_v6 = vmul.f32 %v665_v0, %v53_v11  ;;  %v143_v7 = vmul.f32 %v670_v1, %v54_v12  ;;  %v145_v9 = vmul.f32 %v675_v2, %v55_v13 }
  0x12   :  { %v79_v4 = vadd.f32 %v78_v59, %v70_v54  ;;  %v82_v14 = vadd.f32 %v81_v60, %v73_v55  ;;  %v137_v10 = vsub.f32 %v135_v61, %v136_v40  ;;  %v150_v15 = vmul.f32 %v722_v53, %v724_v57 }
  0x13   :  { %v88_v17 = vsub.f32 0.0, %v85_v5  ;;  %v142_v18 = vsub.f32 %v140_v62, %v141_v6  ;;  %v154_v11 = vmul.f32 %v722_v53, %v717_v52  ;;  %v156_v12 = vmul.f32 %v729_v58, %v717_v52 }
  0x14   :  { %v86_v13 = vsub.f32 0.0, %v79_v4  ;;  %v87_v19 = vsub.f32 0.0, %v82_v14  ;;  %v752_v20 = vadd.f32 %v706_v16, %v137_v10  ;;  %v157_v21 = vmul.f32 %v724_v57, %v735_v63 }
  0x15   :  { %v89_v22 = vmul.f32 %v670_v1, %v88_v17  ;;  %v93_v23 = vmul.f32 %v665_v0, %v88_v17  ;;  %v144_v24 = vsub.f32 %v142_v18, %v143_v7  ;;  %v181_v25 = vmul.f32 %v743_v3, %v717_v52 }
  0x16   :  { %v90_v27 = vmul.f32 %v675_v2, %v87_v19  ;;  %v92_v16 = vmul.f32 %v675_v2, %v86_v13  ;;  %v95_v28 = vmul.f32 %v665_v0, %v87_v19  ;;  %v96_v29 = vmul.f32 %v670_v1, %v86_v13 }
  0x17   :  { %v774_v31 = vsub.f32 %v144_v24, %v145_v9  ;;  %v151_v32 = vmul.f32 %v729_v58, %v752_v20  ;;  %v153_v33 = vmul.f32 %v752_v20, %v735_v63  ;;  %v158_v34 = vsub.f32 %v156_v12, %v157_v21 }
  0x18   :  { %v91_v35 = vsub.f32 %v89_v22, %v90_v27  ;;  %v94_v36 = vsub.f32 %v92_v16, %v93_v23  ;;  %v97_v37 = vsub.f32 %v95_v28, %v96_v29  ;;  %v183_v38 = vmul.f32 %v772_v30, %v724_v57 }
  0x19   :  { %v152_v40 = vsub.f32 %v150_v15, %v151_v32  ;;  %v155_v41 = vsub.f32 %v153_v33, %v154_v11  ;;  %v161_v42 = vmul.f32 2.0, %v158_v34  ;;  %v180_v43 = vmul.f32 %v763_v26, %v774_v31 }
  0x1a   :  { %v98_v44 = vmul.f32 2.0, %v91_v35  ;;  %v99_v45 = vmul.f32 2.0, %v94_v36  ;;  %v100_v46 = vmul.f32 2.0, %v97_v37  ;;  %v185_v47 = vmul.f32 %v785_v39, %v752_v20 }
  0x1b   :  { %v159_v48 = vmul.f32 2.0, %v152_v40  ;;  %v160_v49 = vmul.f32 2.0, %v155_v41  ;;  %v162_v50 = vmul.f32 %v161_v42, %v724_v57  ;;  %v166_v51 = vmul.f32 %v161_v42, %v717_v52 }
  0x1c   :  { %v101_v54 = vmul.f32 %v670_v1, %v100_v46  ;;  %v102_v55 = vmul.f32 %v675_v2, %v99_v45  ;;  %v104_v56 = vmul.f32 %v675_v2, %v98_v44  ;;  %v105_v59 = vmul.f32 %v665_v0, %v100_v46 }
  0x1d   :  { %v107_v60 = vmul.f32 %v665_v0, %v99_v45  ;;  %v108_v61 = vmul.f32 %v670_v1, %v98_v44  ;;  %v110_v62 = vmul.f32 %v695_v8, %v98_v44  ;;  %v113_v5 = vmul.f32 %v695_v8, %v99_v45  ;;  %v14_v0 = vld [vmem:[%s1007_s0] sm:$0xff]  ;;  %v571_v1 = vld [vmem:[%s1007_s0 + $0x8] sm:$0xff] }
  0x1e   :  { %v103_v6 = vsub.f32 %v101_v54, %v102_v55  ;;  %v106_v7 = vsub.f32 %v104_v56, %v105_v59  ;;  %v116_v9 = vmul.f32 %v695_v8, %v100_v46  ;;  %v163_v4 = vmul.f32 %v160_v49, %v752_v20 }
  0x1f   :  { %v109_v14 = vsub.f32 %v107_v60, %v108_v61  ;;  %v111_v10 = vadd.f32 %v110_v62, %v86_v13  ;;  %v114_v15 = vadd.f32 %v113_v5, %v87_v19  ;;  %v165_v2 = vmul.f32 %v159_v48, %v752_v20  ;;  %v572_v13 = vld [vmem:[%s1007_s0 + $0x10] sm:$0xff] }
  0x20   :  { %v117_v18 = vadd.f32 %v116_v9, %v88_v17  ;;  %v164_v11 = vsub.f32 %v162_v50, %v163_v4  ;;  %v168_v12 = vmul.f32 %v160_v49, %v717_v52  ;;  %v169_v8 = vmul.f32 %v159_v48, %v724_v57 }
  0x21   :  { %v112_v19 = vadd.f32 %v111_v10, %v103_v6  ;;  %v115_v21 = vadd.f32 %v114_v15, %v106_v7  ;;  %v167_v22 = vsub.f32 %v165_v2, %v166_v51  ;;  %v171_v23 = vmul.f32 %v159_v48, %v774_v31 }
  0x22   :  { %v118_v24 = vadd.f32 %v117_v18, %v109_v14  ;;  %v170_v27 = vsub.f32 %v168_v12, %v169_v8  ;;  %v174_v16 = vmul.f32 %v160_v49, %v774_v31  ;;  %v177_v17 = vmul.f32 %v161_v42, %v774_v31 }
  0x23   :  { %v147_v28 = vadd.f32 %v112_v19, %v14_v0  ;;  %v148_v29 = vadd.f32 %v571_v1, %v115_v21  ;;  %v172_v32 = vadd.f32 %v171_v23, %v735_v63  ;;  %v182_v33 = vadd.f32 %v181_v25, %v180_v43 }
  0x24   :  { %v149_v34 = vadd.f32 %v572_v13, %v118_v24  ;;  %v175_v35 = vadd.f32 %v729_v58, %v174_v16  ;;  %v178_v36 = vadd.f32 %v722_v53, %v177_v17  ;;  %v187_v37 = vmul.f32 %v785_v39, %v774_v31 }
  0x25   :  { %v173_v40 = vadd.f32 %v172_v32, %v164_v11  ;;  %v184_v41 = vadd.f32 %v183_v38, %v182_v33  ;;  %v188_v44 = vmul.f32 %v772_v30, %v717_v52  ;;  %v190_v42 = vmul.f32 %v743_v3, %v724_v57 }
  0x26   :  { %v176_v45 = vadd.f32 %v175_v35, %v167_v22  ;;  %v179_v46 = vadd.f32 %v178_v36, %v170_v27  ;;  %v192_v63 = vmul.f32 %v763_v26, %v752_v20  ;;  %v194_v58 = vmul.f32 %v772_v30, %v774_v31 }
  0x27   :  { %v831_v53 = vsub.f32 %v184_v41, %v185_v47  ;;  %v189_v25 = vsub.f32 %v187_v37, %v188_v44  ;;  %v195_v38 = vmul.f32 %v785_v39, %v717_v52  ;;  %v197_v43 = vmul.f32 %v763_v26, %v724_v57 }
  0x28   :  { %v199_v50 = vmul.f32 %v743_v3, %v752_v20  ;;  %v839_v51 = vadd.f32 %v173_v40, %v147_v28  ;;  %v841_v54 = vadd.f32 %v176_v45, %v148_v29  ;;  %v843_v55 = vadd.f32 %v179_v46, %v149_v34 }
  0x29   :  { %v191_v48 = vadd.f32 %v190_v42, %v189_v25  ;;  %v196_v49 = vadd.f32 %v195_v38, %v194_v58  ;;  %v211_v59 = vmul.f32 %v831_v53, %v831_v53  ;;  %v201_v6 = vmul.f32 %v743_v3, %v774_v31 }
  0x2a   :  { %v202_v7 = vmul.f32 %v763_v26, %v717_v52  ;;  %v204_v14 = vmul.f32 %v785_v39, %v724_v57  ;;  %v206_v15 = vmul.f32 %v772_v30, %v752_v20  ;;  %v634_v25 = vmov 0.7853982  }
  0x2b   :  { %v845_v47 = vadd.f32 %v192_v63, %v191_v48  ;;  %v198_v56 = vsub.f32 %v196_v49, %v197_v43  ;;  %v635_v49 = vmov -1.0  }
  0x2c   :  { %v203_v4 = vsub.f32 %v201_v6, %v202_v7 }
  0x2d   :  { %v849_v60 = vadd.f32 %v199_v50, %v198_v56  ;;  %v212_v61 = vmul.f32 %v845_v47, %v845_v47 }
  0x2e   :  { %v205_v10 = vsub.f32 %v203_v4, %v204_v14 }
  0x2f   :  { %v213_v62 = vadd.f32 %v212_v61, %v211_v59  ;;  %v214_v5 = vmul.f32 %v849_v60, %v849_v60 }
  0x30   :  { %v866_v2 = vsub.f32 %v205_v10, %v206_v15 }
  0x31   :  { %v859_v9 = vadd.f32 %v214_v5, %v213_v62 }
  0x32   :  { %v225_v31 = vand.u32 2147483647, %v866_v2  ;;  %vm228_vm10 = vcmp.ge.f32.partialorder %v866_v2, 0.0 }
  0x33   :  { %614 = vrsqrt.f32 %v859_v9  ;;  %vm218_vm0 = vcmp.eq.f32.partialorder %v859_v9, inf  ;;  %v221_v3 = vand.u32 2147483648, %v859_v9  ;;  %vm220_vm1 = vcmp.eq.f32.partialorder %v859_v9, 0.0 }
  0x34   :  { %vm226_vm2 = vcmp.lt.f32.partialorder %v225_v31, 1e-06  ;;  %vm258_vm5 = vcmp.lt.f32.partialorder %v225_v31, 0.0  ;;  %vm263_vm6 = vcmp.ne.f32.partialorder %v225_v31, %v225_v31  ;;  %vm269_vm8 = vcmp.eq.s32.totalorder %v225_v31, inf }
  0x35   :  { %v227_v27 = vsel %vm226_vm2, 1.0, %v866_v2  ;;  %v268_v38 = vsel %vm258_vm5, 2.3561945, %v634_v25  ;;  %v281_v43 = vmul.f32 2.0, %v859_v9  ;;  %v229_v50 = vsel %vm228_vm10, 1.0, %v635_v49 }
  0x36   :  { %v282_v28 = vmul.f32 %v227_v27, %v227_v27  ;;  %v230_v5 = vmul.f32 2.0, %v229_v50 }
  0x38   :  { %v283_v33 = vmul.f32 %v282_v28, %v227_v27 }
  0x3a   :  { %v284_v36 = vmul.f32 3.0, %v283_v33 }
  0x3d   :  { %v615_v0 = vpop.eup %614 }
  0x3e   :  { %v217_v52 = vmul.f32 %v615_v0, %v859_v9 }
  0x40   :  { %v219_v26 = vsel %vm218_vm0, %v859_v9, %v217_v52 }
  0x41   :  { %v874_v57 = vsel %vm220_vm1, %v221_v3, %v219_v26 }
  0x42   :  { %v232_v39 = vand.u32 2147483647, %v874_v57  ;;  %vm223_vm3 = vcmp.lt.f32.partialorder %v874_v57, 1e-06  ;;  %vm264_vm7 = vcmp.ne.f32.partialorder %v874_v57, %v874_v57  ;;  %vm261_vm11 = vcmp.eq.f32.partialorder %v874_v57, 0.0 }
  0x43   :  { %v224_v44 = vsel %vm223_vm3, 1.0, %v874_v57  ;;  %vm265_vm12 = vmor %vm263_vm6, %vm264_vm7  ;;  %v274_v61 = vand.u32 2147483648, %v874_v57 }
  0x44   :  { %v234_v20 = vmax.f32 %v225_v31, %v232_v39  ;;  %v233_v30 = vmin.f32 %v225_v31, %v232_v39  ;;  %vm255_vm4 = vcmp.gt.f32.partialorder %v232_v39, %v225_v31  ;;  %vm270_vm9 = vcmp.eq.s32.totalorder %v232_v39, inf }
  0x45   :  { %vm271_vm13 = vmand %vm269_vm8, %vm270_vm9 }
  0x46   :  { %616 = vrcp.f32 %v234_v20 }
  0x47   :  { %618 = vrcp.f32 %v227_v27 }
  0x48   :  { %620 = vrcp.f32 %v284_v36 }
  0x49   :  { %622 = vrcp.f32 %v224_v44 }
  0x50   :  { %v617_v1 = vpop.eup %616 }
  0x51   :  { %v236_v18 = vmul.f32 %v617_v1, %v233_v30  ;;  %v619_v63 = vpop.eup %618 }
  0x52   :  { %v621_v48 = vpop.eup %620  ;;  %v280_v7 = vmul.f32 2.0, %v619_v63 }
  0x53   :  { %v237_v11 = vmul.f32 %v236_v18, %v236_v18  ;;  %v286_v4 = vmul.f32 %v621_v48, %v281_v43  ;;  %v623_v10 = vpop.eup %622 }
  0x55   :  { %v238_v12 = vmul.f32 0.002785687, %v237_v11  ;;  %v287_v2 = vsub.f32 %v280_v7, %v286_v4  ;;  %v638_v7 = vmov 2131351028  }
  0x57   :  { %v239_v8 = vadd.f32 -0.015866, %v238_v12 }
  0x59   :  { %v240_v13 = vmul.f32 %v239_v8, %v237_v11 }
  0x5b   :  { %v241_v19 = vadd.f32 0.04247222, %v240_v13 }
  0x5d   :  { %v242_v21 = vmul.f32 %v241_v19, %v237_v11 }
  0x5f   :  { %v243_v22 = vadd.f32 -0.074975304, %v242_v21 }
  0x61   :  { %v244_v23 = vmul.f32 %v243_v22, %v237_v11 }
  0x63   :  { %v245_v24 = vadd.f32 0.1064488, %v244_v23 }
  0x65   :  { %v246_v16 = vmul.f32 %v245_v24, %v237_v11 }
  0x67   :  { %v247_v17 = vadd.f32 -0.14207031, %v246_v16 }
  0x69   :  { %v248_v29 = vmul.f32 %v247_v17, %v237_v11 }
  0x6b   :  { %v249_v32 = vadd.f32 0.19993454, %v248_v29 }
  0x6d   :  { %v250_v34 = vmul.f32 %v249_v32, %v237_v11 }
  0x6f   :  { %v251_v35 = vadd.f32 -0.33333147, %v250_v34 }
  0x71   :  { %v252_v37 = vmul.f32 %v251_v35, %v237_v11 }
  0x73   :  { %v253_v40 = vmul.f32 %v252_v37, %v236_v18 }
  0x75   :  { %v254_v41 = vadd.f32 %v253_v40, %v236_v18 }
  0x77   :  { %v256_v42 = vsub.f32 1.5707964, %v254_v41 }
  0x79   :  { %v257_v45 = vsel %vm255_vm4, %v256_v42, %v254_v41 }
  0x7a   :  { %v259_v46 = vsub.f32 3.1415927, %v257_v45 }
  0x7c   :  { %v260_v58 = vsel %vm258_vm5, %v259_v46, %v257_v45 }
  0x7d   :  { %v262_v56 = vsel %vm261_vm11, 0.0, %v260_v58 }
  0x7e   :  { %v266_v59 = vsel %vm265_vm12, nan, %v262_v56 }
  0x7f   :  { %v272_v62 = vsel %vm271_vm13, %v268_v38, %v266_v59 }
  0x80   :  { %v273_v6 = vand.u32 2147483647, %v272_v62 }
  0x82   :  { %v275_v14 = vor.u32 %v274_v61, %v273_v6  ;;  %v636_v61 = vmov 683565275  }
  0x84   :  { %v276_v15 = vmul.f32 %v275_v14, %v230_v5  ;;  %v637_v5 = vmov 2475754826   ;;  %v639_v14 = vmov 2102212464  }
  0x86   :  { %v278_v0 = vmul.f32 %v623_v10, %v276_v15  ;;  %v640_v15 = vmov 920167782  }
  0x88   :  { %v288_v9 = vsel %vm223_vm3, %v287_v2, %v278_v0 }
  0x89   :  { %v289_v3 = vmul.f32 %v288_v9, %v831_v53  ;;  %v290_v52 = vmul.f32 %v288_v9, %v845_v47  ;;  %v291_v26 = vmul.f32 %v288_v9, %v849_v60 }
  0x8b   :  { %v292_v31 = vmul.f32 %v289_v3, %v289_v3  ;;  %v293_v39 = vmul.f32 %v290_v52, %v290_v52  ;;  %v295_v20 = vmul.f32 %v291_v26, %v291_v26  ;;  %v526_v30 = vmul.f32 %v290_v52, %v843_v55  ;;  %599 = vst [vmem:[%s1010_s3 + $0x18] sm:$0xff] %v289_v3 }
  0x8c   :  { %600 = vst [vmem:[%s1010_s3 + $0x20] sm:$0xff] %v290_v52  ;;  %601 = vst [vmem:[%s1010_s3 + $0x28] sm:$0xff] %v291_v26  ;;  %v527_v53 = vmul.f32 %v291_v26, %v841_v54  ;;  %v529_v47 = vmul.f32 %v291_v26, %v839_v51  ;;  %v530_v60 = vmul.f32 %v289_v3, %v843_v55 }
  0x8d   :  { %v532_v57 = vmul.f32 %v289_v3, %v841_v54  ;;  %v294_v1 = vadd.f32 %v293_v39, %v292_v31  ;;  %v533_v18 = vmul.f32 %v290_v52, %v839_v51  ;;  %v641_v31 = vmov 1326507024  }
  0x8e   :  { %v528_v11 = vsub.f32 %v526_v30, %v527_v53  ;;  %v531_v12 = vsub.f32 %v529_v47, %v530_v60 }
  0x8f   :  { %v908_v8 = vadd.f32 %v295_v20, %v294_v1  ;;  %v534_v13 = vsub.f32 %v532_v57, %v533_v18 }
  0x90   :  { %v910_v19 = vmul.f32 %v531_v12, %v291_v26  ;;  %v912_v21 = vmul.f32 %v528_v11, %v291_v26  ;;  %v914_v22 = vmul.f32 %v531_v12, %v289_v3  ;;  %v916_v23 = vmul.f32 %v528_v11, %v290_v52 }
  0x91   :  { %624 = vrsqrt.f32 %v908_v8  ;;  %v919_v24 = vmul.f32 %v534_v13, %v290_v52  ;;  %v921_v27 = vmul.f32 %v534_v13, %v289_v3  ;;  %v925_v17 = vmul.f32 0.5, %v528_v11 }
  0x92   :  { %v543_v16 = vsub.f32 %v914_v22, %v916_v23  ;;  %v927_v28 = vmul.f32 0.5, %v531_v12  ;;  %v929_v29 = vmul.f32 0.5, %v534_v13  ;;  %vm299_vm14 = vcmp.eq.f32.partialorder %v908_v8, inf }
  0x93   :  { %v537_v32 = vsub.f32 %v919_v24, %v910_v19  ;;  %v540_v33 = vsub.f32 %v912_v21, %v921_v27  ;;  %v545_v34 = vsub.f32 %v839_v51, %v925_v17  ;;  %v302_v40 = vand.u32 2147483648, %v908_v8 }
  0x94   :  { %v549_v35 = vsub.f32 %v841_v54, %v927_v28  ;;  %v553_v36 = vsub.f32 %v843_v55, %v929_v29  ;;  %vm301_vm15 = vcmp.eq.f32.partialorder %v908_v8, 0.0 }
  0x9b   :  { %v625_v37 = vpop.eup %624 }
  0x9c   :  { %v298_v41 = vmul.f32 %v625_v37, %v908_v8 }
  0x9e   :  { %v300_v44 = vsel %vm299_vm14, %v908_v8, %v298_v41 }
  0x9f   :  { %v946_v42 = vsel %vm301_vm15, %v302_v40, %v300_v44 }
  0xa0   :  { %vm304_vm0 = vcmp.lt.f32.partialorder %v946_v42, 1e-06 }
  0xa1   :  { %v952_v45 = vsel %vm304_vm0, 1.0, %v946_v42 }
  0xa2   :  { %v310_v46 = vand.u32 2139095040, %v952_v45  ;;  %v307_v58 = vand.u32 2147483647, %v952_v45  ;;  %vm309_vm8 = vcmp.lt.s32.totalorder %v952_v45, 0 }
  0xa4   :  { %v311_v63 = vshrl.u32 %v310_v46, 23  ;;  %v314_v43 = vand.u32 8388607, %v307_v58  ;;  %vm308_vm9 = vcmp.le.f32.partialorder %v307_v58, 0.7853982 }
  0xa6   :  { %v589_v25 = vadd.s32 4294967169, %v311_v63  ;;  %v315_v50 = vor.u32 8388608, %v314_v43 }
  0xa8   :  { %v317_v38 = vadd.s32 1, %v589_v25  ;;  %v355_v20 = vshll.u32 %v315_v50, 8 }
  0xaa   :  { %vm318_vm1 = vcmp.gt.s32.totalorder %v317_v38, 0 }
  0xab   :  { %v319_v48 = vsel %vm318_vm1, %v317_v38, 0  ;;  %vm399_vm1 = vweird.f32 %v952_v45 }
  0xac   :  { %v321_v49 = vand.u32 31, %v319_v48  ;;  %v320_v56 = vshrl.u32 %v319_v48, 5 }
  0xae   :  { %v322_v59 = vsub.s32 32, %v321_v49  ;;  %v324_v62 = vshll.u32 %v636_v61, %v321_v49  ;;  %v327_v6 = vshll.u32 %v637_v5, %v321_v49  ;;  %v330_v4 = vshll.u32 %v638_v7, %v321_v49 }
  0xaf   :  { %v333_v10 = vshll.u32 %v639_v14, %v321_v49  ;;  %v336_v2 = vshll.u32 %v640_v15, %v321_v49  ;;  %vm339_vm2 = vcmp.lt.s32.totalorder %v320_v56, 1  ;;  %vm342_vm3 = vcmp.lt.s32.totalorder %v320_v56, 4 }
  0xb0   :  { %v323_v0 = vshrl.u32 %v636_v61, %v322_v59  ;;  %v325_v9 = vshrl.u32 %v637_v5, %v322_v59  ;;  %v328_v3 = vshrl.u32 %v638_v7, %v322_v59  ;;  %v331_v52 = vshrl.u32 %v639_v14, %v322_v59 }
  0xb1   :  { %v334_v26 = vshrl.u32 %v640_v15, %v322_v59  ;;  %v337_v39 = vshrl.u32 %v641_v31, %v322_v59  ;;  %vm340_vm4 = vcmp.lt.s32.totalorder %v320_v56, 2  ;;  %vm341_vm5 = vcmp.lt.s32.totalorder %v320_v56, 3 }
  0xb2   :  { %v326_v30 = vor.u32 %v325_v9, %v324_v62  ;;  %v329_v53 = vor.u32 %v328_v3, %v327_v6  ;;  %v332_v47 = vor.u32 %v331_v52, %v330_v4 }
  0xb3   :  { %v335_v60 = vor.u32 %v334_v26, %v333_v10  ;;  %v338_v57 = vor.u32 %v337_v39, %v336_v2 }
  0xb4   :  { %v343_v1 = vsel %vm339_vm2, %v323_v0, %v326_v30  ;;  %v344_v18 = vsel %vm342_vm3, %v332_v47, 2102212464  ;;  %v347_v11 = vsel %vm339_vm2, %v326_v30, %v329_v53  ;;  %v351_v12 = vsel %vm339_vm2, %v329_v53, %v332_v47 }
  0xb5   :  { %v345_v13 = vsel %vm341_vm5, %v329_v53, %v344_v18  ;;  %v348_v37 = vsel %vm342_vm3, %v335_v60, 920167782  ;;  %v352_v40 = vsel %vm342_vm3, %v338_v57, 1326507024 }
  0xb6   :  { %v349_v41 = vsel %vm341_vm5, %v332_v47, %v348_v37  ;;  %v353_v44 = vsel %vm341_vm5, %v335_v60, %v352_v40  ;;  %v346_v46 = vsel %vm340_vm4, %v343_v1, %v345_v13 }
  0xb7   :  { %v350_v63 = vsel %vm340_vm4, %v347_v11, %v349_v41  ;;  %v354_v25 = vsel %vm340_vm4, %v351_v12, %v353_v44  ;;  %v362_v50 = vmul.u32 %v355_v20, %v346_v46 }
  0xb8   :  { %v958_v38 = vmul.u32.u64.low %v355_v20, %v354_v25  ;;  %v959_v43 = vmul.u32.u64.high %v355_v20, %v354_v25, %v958_v38  ;;  %v961_v48 = vmul.u32.u64.low %v355_v20, %v350_v63  ;;  %v962_v49 = vmul.u32.u64.high %v355_v20, %v350_v63, %v961_v48 }
  0xba   :  { %vm364_vm6 = vc.u32 %v959_v43, %v961_v48  ;;  %v365_v56 = vadd.s32 1, %v962_v49  ;;  %v363_v2 = vadd.s32 %v961_v48, %v959_v43  ;;  %v520_v43 = vmul.f32 2.0, %v952_v45 }
  0xbc   :  { %v366_v59 = vsel %vm364_vm6, %v365_v56, %v962_v49 }
  0xbd   :  { %v367_v61 = vadd.s32 %v366_v59, %v362_v50  ;;  %v306_v50 = vsel %vm304_vm0, 1.0, %v908_v8 }
  0xbf   :  { %v368_v62 = vadd.s32 536870912, %v367_v61 }
  0xc1   :  { %v369_v5 = vshrl.u32 %v368_v62, 30 }
  0xc3   :  { %v370_v6 = vshll.u32 %v369_v5, 30  ;;  %v393_v60 = vsub.s32 4, %v369_v5 }
  0xc5   :  { %v371_v7 = vsub.s32 %v367_v61, %v370_v6  ;;  %v394_v18 = vsel %vm309_vm8, %v393_v60, %v369_v5  ;;  %v515_v6 = vmul.f32 0.0013888889, %v908_v8 }
  0xc6   :  { %v396_v13 = vsel %vm308_vm9, 0, %v394_v18 }
  0xc7   :  { %v373_v4 = vsub.s32 0, %v371_v7  ;;  %v400_v37 = vadd.s32 3, %v396_v13  ;;  %v504_v41 = vand.u32 3, %v396_v13 }
  0xc9   :  { %v590_v14 = vmin.u32 %v373_v4, %v371_v7  ;;  %v401_v40 = vand.u32 3, %v400_v37  ;;  %vm509_vm11 = vcmp.eq.s32.totalorder %v504_v41, 2  ;;  %vm506_vm13 = vcmp.eq.s32.totalorder %v504_v41, 0 }
  0xca   :  { %vm505_vm15 = vcmp.lt.s32.totalorder %v504_v41, 2 }
  0xcb   :  { %v375_v10 = vclz %v590_v14  ;;  %vm406_vm10 = vcmp.eq.s32.totalorder %v401_v40, 2  ;;  %vm403_vm12 = vcmp.eq.s32.totalorder %v401_v40, 0  ;;  %vm402_vm14 = vcmp.lt.s32.totalorder %v401_v40, 2 }
  0xcd   :  { %v591_v15 = vadd.s32 4294967294, %v375_v10  ;;  %v516_v10 = vadd.f32 0.083333336, %v515_v6 }
  0xcf   :  { %vm592_vm7 = vcmp.lt.s32.totalorder %v591_v15, 0 }
  0xd0   :  { %v378_v0 = vsel %vm592_vm7, 0, %v591_v15 }
  0xd1   :  { %v379_v9 = vsub.s32 32, %v378_v0  ;;  %v380_v3 = vshll.u32 %v371_v7, %v378_v0  ;;  %v383_v52 = vsub.s32 4294967266, %v378_v0 }
  0xd3   :  { %v381_v26 = vshrl.u32 %v363_v2, %v379_v9  ;;  %v384_v31 = vadd.s32 127, %v383_v52 }
  0xd5   :  { %v382_v39 = vor.u32 %v381_v26, %v380_v3  ;;  %v385_v20 = vshll.u32 %v384_v31, 23 }
  0xd7   :  { %v386_v30 = vor.u32 4788187, %v385_v20  ;;  %v389_v53 = vcvt.s32.f32 %v382_v39 }
  0xd9   :  { %v387_v47 = vand.u32 2147483647, %v386_v30 }
  0xdb   :  { %v390_v57 = vmul.f32 %v389_v53, %v387_v47 }
  0xdd   :  { %v391_v1 = vxor.u32 2147483648, %v390_v57 }
  0xdf   :  { %v392_v11 = vsel %vm309_vm8, %v391_v1, %v390_v57 }
  0xe0   :  { %v395_v12 = vsel %vm308_vm9, %v952_v45, %v392_v11 }
  0xe1   :  { %626 = vcosq.f32 %v395_v12 }
  0xe2   :  { %628 = vsinq.f32 %v395_v12 }
  0xe3   :  { %630 = vrcp.f32 %v306_v50 }
  0xeb   :  { %v627_v44 = vpop.eup %626 }
  0xec   :  { %v629_v46 = vpop.eup %628  ;;  %v407_v63 = vxor.u32 2147483648, %v627_v44 }
  0xed   :  { %v404_v58 = vxor.u32 2147483648, %v629_v46  ;;  %v631_v4 = vpop.eup %630 }
  0xee   :  { %v408_v25 = vsel %vm406_vm10, %v407_v63, %v629_v46  ;;  %v511_v38 = vsel %vm509_vm11, %v407_v63, %v629_v46 }
  0xef   :  { %v405_v48 = vsel %vm403_vm12, %v627_v44, %v404_v58  ;;  %v508_v49 = vsel %vm506_vm13, %v627_v44, %v404_v58 }
  0xf0   :  { %v409_v56 = vsel %vm402_vm14, %v405_v48, %v408_v25  ;;  %v512_v59 = vsel %vm505_vm15, %v508_v49, %v511_v38 }
  0xf1   :  { %v410_v61 = vsel %vm399_vm1, nan, %v409_v56  ;;  %v513_v62 = vsel %vm399_vm1, nan, %v512_v59 }
  0xf2   :  { %v521_v5 = vmul.f32 %v520_v43, %v410_v61  ;;  %v519_v7 = vadd.f32 1.0, %v513_v62 }
  0xf4   :  { %632 = vrcp.f32 %v521_v5 }
  0xfe   :  { %v633_v14 = vpop.eup %632 }
  0xff   :  { %v523_v45 = vmul.f32 %v633_v14, %v519_v7 }
 0x101   :  { %v524_v15 = vsub.f32 %v631_v4, %v523_v45 }
 0x103   :  { %v525_v2 = vsel %vm304_vm0, %v516_v10, %v524_v15 }
 0x104   :  { %v546_v0 = vmul.f32 %v537_v32, %v525_v2  ;;  %v550_v9 = vmul.f32 %v540_v33, %v525_v2  ;;  %v554_v8 = vmul.f32 %v543_v16, %v525_v2 }
 0x106   :  { %v547_v3 = vadd.f32 %v546_v0, %v545_v34  ;;  %v551_v42 = vadd.f32 %v550_v9, %v549_v35  ;;  %v555_v19 = vadd.f32 %v554_v8, %v553_v36 }
 0x108   :  { %556 = vst [vmem:[%s1010_s3] sm:$0xff] %v547_v3  ;;  %597 = vst [vmem:[%s1010_s3 + $0x8] sm:$0xff] %v551_v42 }
 0x109   :  { %598 = vst [vmem:[%s1010_s3 + $0x10] sm:$0xff] %v555_v19 }

</bundles_post_ra>
